<compile_context>
chip_gen: v5e
topology: v5e:2x2
jax: 0.10.0
libtpu: 0.0.40
codegen_flags: <defaults>
</compile_context>

<pallas_src>
import functools

import jax
import jax.numpy as jnp
from jax import lax
from jax.experimental import pallas as pl
from jax.experimental.pallas import tpu as pltpu

EPS = 1e-5  # nn.BatchNorm1d default eps


# ---------------- Pass 1: conv-as-GEMM + BN statistics ---------------- #
def _gemm_stats_kernel(w_ref, p_ref, y_ref, stat_ref):
    """w: (C_out, Kd), p: (Kd, tm) -> y: (C_out, tm); stats (C_out, 2) accumulated."""
    i = pl.program_id(0)

    @pl.when(i == 0)
    def _init():
        stat_ref[...] = jnp.zeros_like(stat_ref)

    y = jnp.dot(w_ref[...], p_ref[...], preferred_element_type=jnp.float32)
    y_ref[...] = y

    # Per-channel running sum / sum-of-squares across M tiles.
    # (Zero-padded tail columns contribute exactly 0 to both.)
    stat_ref[:, 0:1] += jnp.sum(y, axis=1, keepdims=True)
    stat_ref[:, 1:2] += jnp.sum(y * y, axis=1, keepdims=True)


# ---------------- Pass 2: normalize + affine + ReLU ---------------- #
def _bn_relu_kernel(stat_ref, gamma_ref, beta_ref, y_ref, out_ref, *, inv_m):
    mean = stat_ref[:, 0:1] * inv_m                       # (C_out, 1)
    var = stat_ref[:, 1:2] * inv_m - mean * mean          # biased variance
    scale = gamma_ref[...] * lax.rsqrt(var + EPS)         # (C_out, 1)
    offset = beta_ref[...] - mean * scale
    out_ref[...] = jnp.maximum(y_ref[...] * scale + offset, 0.0)


def _choose_tile(m, kd, c_out):
    """Largest lane-tile (multiple of 128) whose double-buffered VMEM fits."""
    budget = 6 * 1024 * 1024  # bytes, conservative (v7x has 64 MiB total)
    tile = 128
    for t in (128, 256, 512, 1024, 2048, 4096):
        if 2 * (kd + 2 * c_out) * t * 4 <= budget:
            tile = t
    m_pad128 = ((m + 127) // 128) * 128
    return min(tile, m_pad128)


def conv1d_bn_relu(x, weight, bias, gamma, beta, frame_size, shift):
    """x: (N, C_in, L) f32; weight: (C_out, C_in, K); returns (N, C_out, L_out)."""
    del bias  # conv bias is exactly cancelled by the BatchNorm mean subtraction

    N, C_in, L = x.shape
    C_out, _, K = weight.shape
    assert K == frame_size
    L_out = (L - K) // shift + 1
    M = N * L_out
    Kd = C_in * K

    # ---- glue: strided-slice im2col, built directly in the flipped (Kd, M)
    # layout so the long M axis is the lane dimension everywhere. ----
    cols = [
        lax.slice(x, (0, 0, k), (N, C_in, k + (L_out - 1) * shift + 1),
                  (1, 1, shift))                                  # (N, C_in, L_out)
        for k in range(K)
    ]
    patches_t = jnp.stack(cols, axis=0)                           # (K, N, C_in, L_out)
    patches_t = jnp.transpose(patches_t, (2, 0, 1, 3)).reshape(Kd, M)

    tm = _choose_tile(M, Kd, C_out)
    M_pad = ((M + tm - 1) // tm) * tm
    if M_pad != M:
        # Zero columns are exact no-ops for the statistics.
        patches_t = jnp.pad(patches_t, ((0, 0), (0, M_pad - M)))
    n_tiles = M_pad // tm

    w2d = weight.reshape(C_out, Kd).astype(jnp.float32)
    g2d = gamma.reshape(C_out, 1).astype(jnp.float32)
    b2d = beta.reshape(C_out, 1).astype(jnp.float32)
    patches_t = patches_t.astype(jnp.float32)

    # ---- pass 1: lane-dense GEMM, accumulate per-channel sum / sumsq ----
    y, stats = pl.pallas_call(
        _gemm_stats_kernel,
        out_shape=(
            jax.ShapeDtypeStruct((C_out, M_pad), jnp.float32),
            jax.ShapeDtypeStruct((C_out, 2), jnp.float32),
        ),
        grid=(n_tiles,),
        in_specs=[
            pl.BlockSpec((C_out, Kd), lambda i: (0, 0)),   # weights (resident)
            pl.BlockSpec((Kd, tm), lambda i: (0, i)),      # patch tile
        ],
        out_specs=(
            pl.BlockSpec((C_out, tm), lambda i: (0, i)),   # y tile
            pl.BlockSpec((C_out, 2), lambda i: (0, 0)),    # stats accumulator
        ),
        compiler_params=pltpu.CompilerParams(
            dimension_semantics=("arbitrary",)),           # stats accumulate across M
        cost_estimate=pl.CostEstimate(
            flops=2 * M_pad * Kd * C_out,
            transcendentals=0,
            bytes_accessed=4 * (Kd * M_pad + C_out * Kd + C_out * M_pad + 2 * C_out),
        ),
    )(w2d, patches_t)

    # ---- pass 2: normalize + affine + ReLU (independent per tile) ----
    out2d = pl.pallas_call(
        functools.partial(_bn_relu_kernel, inv_m=1.0 / M),
        out_shape=jax.ShapeDtypeStruct((C_out, M_pad), jnp.float32),
        grid=(n_tiles,),
        in_specs=[
            pl.BlockSpec((C_out, 2), lambda i: (0, 0)),    # stats
            pl.BlockSpec((C_out, 1), lambda i: (0, 0)),    # gamma
            pl.BlockSpec((C_out, 1), lambda i: (0, 0)),    # beta
            pl.BlockSpec((C_out, tm), lambda i: (0, i)),   # y tile
        ],
        out_specs=pl.BlockSpec((C_out, tm), lambda i: (0, i)),
        compiler_params=pltpu.CompilerParams(
            dimension_semantics=("parallel",)),            # megacore-friendly
        cost_estimate=pl.CostEstimate(
            flops=4 * C_out * M_pad,
            transcendentals=C_out,
            bytes_accessed=4 * 2 * C_out * M_pad,
        ),
    )(stats, g2d, b2d, y)

    # (C_out, M) with M = n*L_out + t  ->  (N, C_out, L_out)
    out2d = out2d[:, :M].reshape(C_out, N, L_out)
    return jnp.transpose(out2d, (1, 0, 2))


# ---------------- pure-JAX reference (with the conv bias, to verify the
# cancellation by BatchNorm is exact within tolerance) ---------------- #
def _reference(x, weight, bias, gamma, beta, shift):
    y = lax.conv_general_dilated(
        x, weight, window_strides=(shift,), padding="VALID",
        dimension_numbers=("NCH", "OIH", "NCH"))
    y = y + bias[None, :, None]
    mean = jnp.mean(y, axis=(0, 2), keepdims=True)
    var = jnp.mean((y - mean) ** 2, axis=(0, 2), keepdims=True)
    y = gamma[None, :, None] * (y - mean) * lax.rsqrt(var + EPS) + beta[None, :, None]
    return jnp.maximum(y, 0.0)


if __name__ == "__main__":
    # Small, deterministic config consistent with the module's forward.
    N, C_in, L = 2, 4, 16
    C_out, frame_size, shift = 8, 3, 2

    key = jax.random.PRNGKey(0)
    kx, kw, kb = jax.random.split(key, 3)

    x = jax.random.normal(kx, (N, C_in, L), dtype=jnp.float32)
    fan_in = C_in * frame_size
    bound = 1.0 / (fan_in ** 0.5)
    weight = jax.random.uniform(kw, (C_out, C_in, frame_size),
                                minval=-bound, maxval=bound, dtype=jnp.float32)
    bias = jax.random.uniform(kb, (C_out,), minval=-bound, maxval=bound,
                              dtype=jnp.float32)
    gamma = jnp.ones((C_out,), jnp.float32)   # BatchNorm1d default weight
    beta = jnp.zeros((C_out,), jnp.float32)   # BatchNorm1d default bias

    conv_fn = jax.jit(conv1d_bn_relu, static_argnames=("frame_size", "shift"))
    out = conv_fn(x, weight, bias, gamma, beta, frame_size=frame_size, shift=shift)
    out = jax.block_until_ready(out)

    ref = _reference(x, weight, bias, gamma, beta, shift)
    assert out.shape == ref.shape == (N, C_out, (L - frame_size) // shift + 1)
    assert jnp.allclose(out, ref, atol=1e-4, rtol=1e-4), "mismatch vs reference"

    print("KERNEL_OK")
</pallas_src>

<mosaic_0001>
module attributes {stable_mosaic.version = 11 : i64} {
  func.func @_bn_relu_kernel(%arg0: i32, %arg1: memref<8x2xf32, #tpu.memory_space<vmem>>, %arg2: memref<8x1xf32, #tpu.memory_space<vmem>>, %arg3: memref<8x1xf32, #tpu.memory_space<vmem>>, %arg4: memref<8x128xf32, #tpu.memory_space<vmem>>, %arg5: memref<8x128xf32, #tpu.memory_space<vmem>>) attributes {dimension_semantics = [#tpu.dimension_semantics<parallel>], iteration_bounds = array<i64: 1>, scalar_prefetch = 0 : i64, scratch_operands = 0 : i64, tpu.core_type = #tpu.core_type<tc>, window_params = [{pipeline_mode = #tpu.pipeline_mode<synchronous>, transform_indices = @transform_0, window_bounds = array<i64: 8, 2>}, {pipeline_mode = #tpu.pipeline_mode<synchronous>, transform_indices = @transform_1, window_bounds = array<i64: 8, 1>}, {pipeline_mode = #tpu.pipeline_mode<synchronous>, transform_indices = @transform_2, window_bounds = array<i64: 8, 1>}, {transform_indices = @transform_3, window_bounds = array<i64: 8, 128>}, {transform_indices = @transform_4, window_bounds = array<i64: 8, 128>}]} {
    %c0 = arith.constant 0 : index
    %c0_0 = arith.constant 0 : index
    %0 = vector.load %arg1[%c0, %c0_0] : memref<8x2xf32, #tpu.memory_space<vmem>>, vector<8x1xf32>
    %cst = arith.constant 0.0714285746 : f32
    %1 = vector.broadcast %cst : f32 to vector<8x1xf32>
    %2 = arith.mulf %0, %1 : vector<8x1xf32>
    %c0_1 = arith.constant 0 : index
    %c1 = arith.constant 1 : index
    %3 = vector.load %arg1[%c0_1, %c1] : memref<8x2xf32, #tpu.memory_space<vmem>>, vector<8x1xf32>
    %cst_2 = arith.constant 0.0714285746 : f32
    %4 = vector.broadcast %cst_2 : f32 to vector<8x1xf32>
    %5 = arith.mulf %3, %4 : vector<8x1xf32>
    %6 = arith.mulf %2, %2 : vector<8x1xf32>
    %7 = arith.subf %5, %6 : vector<8x1xf32>
    %c0_3 = arith.constant 0 : index
    %c0_4 = arith.constant 0 : index
    %8 = vector.load %arg2[%c0_3, %c0_4] : memref<8x1xf32, #tpu.memory_space<vmem>>, vector<8x1xf32>
    %cst_5 = arith.constant 9.99999974E-6 : f32
    %9 = vector.broadcast %cst_5 : f32 to vector<8x1xf32>
    %10 = arith.addf %7, %9 : vector<8x1xf32>
    %11 = math.rsqrt %10 : vector<8x1xf32>
    %12 = arith.mulf %8, %11 : vector<8x1xf32>
    %c0_6 = arith.constant 0 : index
    %c0_7 = arith.constant 0 : index
    %13 = vector.load %arg3[%c0_6, %c0_7] : memref<8x1xf32, #tpu.memory_space<vmem>>, vector<8x1xf32>
    %14 = arith.mulf %2, %12 : vector<8x1xf32>
    %15 = arith.subf %13, %14 : vector<8x1xf32>
    %c0_8 = arith.constant 0 : index
    %c0_9 = arith.constant 0 : index
    %16 = vector.load %arg4[%c0_8, %c0_9] : memref<8x128xf32, #tpu.memory_space<vmem>>, vector<8x128xf32>
    %17 = vector.broadcast %12 : vector<8x1xf32> to vector<8x128xf32>
    %18 = arith.mulf %16, %17 : vector<8x128xf32>
    %19 = vector.broadcast %15 : vector<8x1xf32> to vector<8x128xf32>
    %20 = arith.addf %18, %19 : vector<8x128xf32>
    %cst_10 = arith.constant 0.000000e+00 : f32
    %21 = vector.broadcast %cst_10 : f32 to vector<8x128xf32>
    %22 = arith.maximumf %20, %21 : vector<8x128xf32>
    %c0_11 = arith.constant 0 : index
    %c0_12 = arith.constant 0 : index
    %23 = vector.load %arg5[%c0_11, %c0_12] : memref<8x128xf32, #tpu.memory_space<vmem>>, vector<8x128xf32>
    tpu.vector_store %arg5[%c0_11, %c0_12], %22 {strides = array<i32>} : memref<8x128xf32, #tpu.memory_space<vmem>>, vector<8x128xf32>,
    return
  }
  func.func @transform_0(%arg0: i32) -> (i32, i32) {
    %c0_i32 = arith.constant 0 : i32
    %c0_i32_0 = arith.constant 0 : i32
    %c0_i32_1 = arith.constant 0 : i32
    return %c0_i32, %c0_i32_0 : i32, i32
  }
  func.func @transform_1(%arg0: i32) -> (i32, i32) {
    %c0_i32 = arith.constant 0 : i32
    %c0_i32_0 = arith.constant 0 : i32
    %c0_i32_1 = arith.constant 0 : i32
    return %c0_i32, %c0_i32_0 : i32, i32
  }
  func.func @transform_2(%arg0: i32) -> (i32, i32) {
    %c0_i32 = arith.constant 0 : i32
    %c0_i32_0 = arith.constant 0 : i32
    %c0_i32_1 = arith.constant 0 : i32
    return %c0_i32, %c0_i32_0 : i32, i32
  }
  func.func @transform_3(%arg0: i32) -> (i32, i32) {
    %c0_i32 = arith.constant 0 : i32
    %c0_i32_0 = arith.constant 0 : i32
    return %c0_i32, %arg0 : i32, i32
  }
  func.func @transform_4(%arg0: i32) -> (i32, i32) {
    %c0_i32 = arith.constant 0 : i32
    %c0_i32_0 = arith.constant 0 : i32
    return %c0_i32, %arg0 : i32, i32
  }
}

module attributes {stable_mosaic.version = 11 : i64} {
  func.func @_gemm_stats_kernel(%arg0: i32, %arg1: memref<8x12xf32, #tpu.memory_space<vmem>>, %arg2: memref<12x128xf32, #tpu.memory_space<vmem>>, %arg3: memref<8x128xf32, #tpu.memory_space<vmem>>, %arg4: memref<8x2xf32, #tpu.memory_space<vmem>>) attributes {dimension_semantics = [#tpu.dimension_semantics<arbitrary>], iteration_bounds = array<i64: 1>, scalar_prefetch = 0 : i64, scratch_operands = 0 : i64, tpu.core_type = #tpu.core_type<tc>, window_params = [{pipeline_mode = #tpu.pipeline_mode<synchronous>, transform_indices = @transform_0, window_bounds = array<i64: 8, 12>}, {transform_indices = @transform_1, window_bounds = array<i64: 12, 128>}, {transform_indices = @transform_2, window_bounds = array<i64: 8, 128>}, {pipeline_mode = #tpu.pipeline_mode<synchronous>, transform_indices = @transform_3, window_bounds = array<i64: 8, 2>}]} {
    %c0_i32 = arith.constant 0 : i32
    %0 = arith.cmpi eq, %arg0, %c0_i32 : i32
    %1 = arith.extui %0 : i1 to i32
    %c0_i32_0 = arith.constant 0 : i32
    %2 = arith.cmpi ne, %1, %c0_i32_0 : i32
    scf.if %2 {
      %cst_15 = arith.constant 0.000000e+00 : f32
      %18 = vector.broadcast %cst_15 : f32 to vector<8x2xf32>
      %c0_16 = arith.constant 0 : index
      %c0_17 = arith.constant 0 : index
      %19 = vector.load %arg4[%c0_16, %c0_17] : memref<8x2xf32, #tpu.memory_space<vmem>>, vector<8x2xf32>
      tpu.vector_store %arg4[%c0_16, %c0_17], %18 {strides = array<i32>} : memref<8x2xf32, #tpu.memory_space<vmem>>, vector<8x2xf32>,
    } else {
    }
    %c0 = arith.constant 0 : index
    %c0_1 = arith.constant 0 : index
    %3 = vector.load %arg1[%c0, %c0_1] : memref<8x12xf32, #tpu.memory_space<vmem>>, vector<8x12xf32>
    %c0_2 = arith.constant 0 : index
    %c0_3 = arith.constant 0 : index
    %4 = vector.load %arg2[%c0_2, %c0_3] : memref<12x128xf32, #tpu.memory_space<vmem>>, vector<12x128xf32>
    %cst = arith.constant dense<0.000000e+00> : vector<8x128xf32>
    %5 = tpu.matmul %3, %4, %cst {dimension_numbers = #tpu.dot_dimension_numbers<[1], [0], [0], [1], [0, 0, 1, 1], [], []>} : vector<8x12xf32>, vector<12x128xf32>, vector<8x128xf32> -> vector<8x128xf32>
    %c0_4 = arith.constant 0 : index
    %c0_5 = arith.constant 0 : index
    %6 = vector.load %arg3[%c0_4, %c0_5] : memref<8x128xf32, #tpu.memory_space<vmem>>, vector<8x128xf32>
    tpu.vector_store %arg3[%c0_4, %c0_5], %5 {strides = array<i32>} : memref<8x128xf32, #tpu.memory_space<vmem>>, vector<8x128xf32>,
    %c0_6 = arith.constant 0 : index
    %c0_7 = arith.constant 0 : index
    %7 = vector.load %arg4[%c0_6, %c0_7] : memref<8x2xf32, #tpu.memory_space<vmem>>, vector<8x1xf32>
    %cst_8 = arith.constant dense<0.000000e+00> : vector<8xf32>
    %8 = vector.multi_reduction <add>, %5, %cst_8 [1] : vector<8x128xf32> to vector<8xf32>
    %9 = vector.shape_cast %8 : vector<8xf32> to vector<8x1xf32>
    %10 = arith.addf %7, %9 : vector<8x1xf32>
    %c0_9 = arith.constant 0 : index
    %c0_10 = arith.constant 0 : index
    %11 = vector.load %arg4[%c0_9, %c0_10] : memref<8x2xf32, #tpu.memory_space<vmem>>, vector<8x1xf32>
    tpu.vector_store %arg4[%c0_9, %c0_10], %10 {strides = array<i32>} : memref<8x2xf32, #tpu.memory_space<vmem>>, vector<8x1xf32>,
    %c0_11 = arith.constant 0 : index
    %c1 = arith.constant 1 : index
    %12 = vector.load %arg4[%c0_11, %c1] : memref<8x2xf32, #tpu.memory_space<vmem>>, vector<8x1xf32>
    %13 = arith.mulf %5, %5 : vector<8x128xf32>
    %cst_12 = arith.constant dense<0.000000e+00> : vector<8xf32>
    %14 = vector.multi_reduction <add>, %13, %cst_12 [1] : vector<8x128xf32> to vector<8xf32>
    %15 = vector.shape_cast %14 : vector<8xf32> to vector<8x1xf32>
    %16 = arith.addf %12, %15 : vector<8x1xf32>
    %c0_13 = arith.constant 0 : index
    %c1_14 = arith.constant 1 : index
    %17 = vector.load %arg4[%c0_13, %c1_14] : memref<8x2xf32, #tpu.memory_space<vmem>>, vector<8x1xf32>
    tpu.vector_store %arg4[%c0_13, %c1_14], %16 {strides = array<i32>} : memref<8x2xf32, #tpu.memory_space<vmem>>, vector<8x1xf32>,
    return
  }
  func.func @transform_0(%arg0: i32) -> (i32, i32) {
    %c0_i32 = arith.constant 0 : i32
    %c0_i32_0 = arith.constant 0 : i32
    %c0_i32_1 = arith.constant 0 : i32
    return %c0_i32, %c0_i32_0 : i32, i32
  }
  func.func @transform_1(%arg0: i32) -> (i32, i32) {
    %c0_i32 = arith.constant 0 : i32
    %c0_i32_0 = arith.constant 0 : i32
    return %c0_i32, %arg0 : i32, i32
  }
  func.func @transform_2(%arg0: i32) -> (i32, i32) {
    %c0_i32 = arith.constant 0 : i32
    %c0_i32_0 = arith.constant 0 : i32
    return %c0_i32, %arg0 : i32, i32
  }
  func.func @transform_3(%arg0: i32) -> (i32, i32) {
    %c0_i32 = arith.constant 0 : i32
    %c0_i32_0 = arith.constant 0 : i32
    %c0_i32_1 = arith.constant 0 : i32
    return %c0_i32, %c0_i32_0 : i32, i32
  }
}

</mosaic_0001>

<bundles_post_ra>
// kernel: conv1d_bn_relu.3
= control target key start
LH: loop header
LB: loop body
LE: loop exit
PB: predicated region body
PF: predicated region fallthrough
CT: control target
= control target key end

     0   :  { %s71_s17 = smov 1   ;;  %s72_s18 = smov 127   ;;  %v73_v13 = vmov 0   ;;  %s114_s0 = inlined_call_operand.vmem [shape: f32[8,2], index: 0, kind: input, shape index: {}]   ;;  %s115_s1 = inlined_call_operand.vmem [shape: f32[8,1], index: 1, kind: input, shape index: {}]   ;;  %s116_s2 = inlined_call_operand.vmem [shape: f32[8,1], index: 2, kind: input, shape index: {}]   ;;  %s117_s3 = inlined_call_operand.vmem [shape: f32[8,128], index: 3, kind: input, shape index: {}]   ;;  %s118_s4 = inlined_call_operand.vmem [shape: f32[8,128], index: 4, kind: output, shape index: {}]  }
   0x1   :  { %v17_v0 = vld [vmem:[%s114_s0] sm:$0xff]  ;;  %67 = vset.pattern.permute.xlu1 %v73_v13  ;;  %68 = vset.pattern.permute.xlu0 %v73_v13 }
   0x2   :  { %v18_v1 = vmul.f32 0.071428575, %v17_v0  ;;  %v25_v14 = vld [vmem:[%s115_s1] sm:$0xff] }
   0x3   :  { %v42_v18 = vld [vmem:[%s116_s2] sm:$0xff] }
   0x4   :  { %v19_v2 = vmul.f32 %v18_v1, %v18_v1  ;;  %v45_v21 = vld [vmem:[%s117_s3] sm:$0xff] }
   0x6   :  { %21 = vrot.lane.b32.xlu0 %v19_v2, %s71_s17 }
  0x78   :  { %v22_v3 = vpop.permute.xlu0 %21 }
  0x79   :  { %v24_v4 = vsub.f32 %v18_v1, %v22_v3 }
  0x7b   :  { %v26_v5 = vadd.f32 1e-05, %v24_v4 }
  0x7d   :  { %69 = vrsqrt.f32 %v26_v5  ;;  %vm33_vm1 = vweird.f32 %v26_v5 }
  0x83   :  { %v70_v6 = vpop.eup %69 }
  0x84   :  { %v28_v7 = vmul.f32 %v70_v6, %v26_v5  ;;  %vm34_vm0 = vweird.f32 %v70_v6 }
  0x85   :  { %vm35_vm2 = vmor %vm33_vm1, %vm34_vm0 }
  0x86   :  { %v29_v8 = vmul.f32 %v70_v6, %v28_v7 }
  0x88   :  { %v30_v9 = vmul.f32 0.5, %v29_v8 }
  0x8a   :  { %v31_v10 = vsub.f32 1.5, %v30_v9 }
  0x8c   :  { %v32_v11 = vmul.f32 %v70_v6, %v31_v10 }
  0x8e   :  { %v36_v12 = vsel %vm35_vm2, %v70_v6, %v32_v11 }
  0x8f   :  { %38 = vrot.lane.b32.xlu0 %v36_v12, %s72_s18 }
 0x101   :  { %v39_v15 = vpop.permute.xlu0 %38 }
 0x102   :  { %v41_v16 = vmul.f32 %v39_v15, %v25_v14 }
 0x104   :  { %48 = vperm.xlu1 %67, %v41_v16   ;;  %v43_v17 = vmul.f32 %v41_v16, %v18_v1 }
 0x106   :  { %v44_v19 = vsub.f32 %v42_v18, %v43_v17 }
 0x10c   :  { %54 = vperm.xlu1 %67, %v44_v19  }
 0x176   :  { %v49_v20 = vpop.permute.xlu1 %48 }
 0x177   :  { %v51_v22 = vmul.f32 %v49_v20, %v45_v21 }
 0x17e   :  { %v55_v23 = vpop.permute.xlu1 %54 }
 0x17f   :  { %v57_v24 = vadd.f32 %v55_v23, %v51_v22 }
 0x181   :  { %v58_v25 = vmax.f32 %v57_v24, 0.0 }
 0x183   :  { %59 = vst [vmem:[%s118_s4] sm:$0xff] %v58_v25 }

// kernel: conv1d_bn_relu.2
= control target key start
LH: loop header
LB: loop body
LE: loop exit
PB: predicated region body
PF: predicated region fallthrough
CT: control target
= control target key end

     0   :  { %vm26_vm0 = vcmask 1043456   ;;  %vm22_vm1 = vcmask 97280   ;;  %vm17_vm2 = vcmask 15360   ;;  %v75_v3 = vmov 0.0   ;;  %s123_s1 = inlined_call_operand.vmem [shape: f32[12,128], index: 1, kind: input, shape index: {}]   ;;  %s124_s0 = inlined_call_operand.vmem [shape: f32[8,12], index: 0, kind: input, shape index: {}]   ;;  %s125_s3 = inlined_call_operand.vmem [shape: f32[8,2], index: 3, kind: output, shape index: {1}]   ;;  %s126_s2 = inlined_call_operand.vmem [shape: f32[8,128], index: 2, kind: output, shape index: {0}]  }
   0x1   :  { %v21_v0 = vld [vmem:[%s123_s1 + $0x8] sm:$0xf]  ;;  %v20_v1 = vld [vmem:[%s123_s1] sm:$0xff]  ;;  %18 = vst.msk [vmem:[%s125_s3] sm:$0xff] %vm17_vm2, %v75_v3  ;;  %vm55_vm3 = vcmask 7168   ;;  %vm62_vm4 = vcmask 15368  }
   0x2   :  { %72 = vmatpush.msk.msra.mxu0 %vm26_vm0, %v21_v0  ;;  %v19_v2 = vld [vmem:[%s124_s0] sm:$0xff] }
   0x4   :  { %45 = vmatpush.msra.mxu0 %v20_v1 }
   0x5   :  { %73 = vmatmul.msk.f32.vlgmr.msra.gmra.mxu0 %vm22_vm1, %v19_v2 }
   0x8   :  { %v51_v6 = vld [vmem:[%s125_s3] sm:$0xff] }
  0x82   :  { %v47_v4 = vpop.f32.mrf.mxu0 }
  0x83   :  { %50 = vst [vmem:[%s126_s2] sm:$0xff] %v47_v4  ;;  %52 = vadd.xlane.f32.xlu0 %v47_v4  ;;  %v58_v5 = vmul.f32 %v47_v4, %v47_v4 }
  0x8b   :  { %59 = vadd.xlane.f32.xlu0 %v58_v5 }
  0xf6   :  { %v53_v7 = vpop.xlane.xlu0 %52 }
  0xf7   :  { %v54_v8 = vadd.f32 %v53_v7, %v51_v6 }
  0xf9   :  { %56 = vst.msk [vmem:[%s125_s3] sm:$0xff] %vm55_vm3, %v54_v8 }
  0xfe   :  { %v60_v10 = vpop.xlane.xlu0 %59 }
 0x100   :  { %v57_v9 = vld [vmem:[%s125_s3] sm:$0xff] }
 0x101   :  { %v61_v11 = vadd.f32 %v60_v10, %v57_v9 }
 0x103   :  { %63 = vst.msk [vmem:[%s125_s3] sm:$0xff] %vm62_vm4, %v61_v11 }

</bundles_post_ra>
